<compile_context>
chip_gen: v6e
topology: v6e:2x2x1
jax: 0.10.0
libtpu: 0.0.40
codegen_flags: <defaults>
</compile_context>

<pallas_src>
import functools

import jax
import jax.numpy as jnp
from jax.experimental import pallas as pl
from jax.experimental.pallas import tpu as pltpu


def _attn_pool_kernel(x_ref, q_ref, o_ref, m_sc, l_sc, acc_sc, *,
                      t_total, mask_t):
    # x_ref: (block_b, block_t, e) input tile (native dtype)
    # q_ref: (1, e) shared query (lane-major, native dtype)
    # o_ref: (block_b, e) pooled output
    # scratch (f32): m_sc (block_b, 1), l_sc (block_b, 1), acc_sc (block_b, e)
    j = pl.program_id(1)
    nt = pl.num_programs(1)

    @pl.when(j == 0)
    def _init():
        m_sc[...] = jnp.full_like(m_sc, -jnp.inf)
        l_sc[...] = jnp.zeros_like(l_sc)
        acc_sc[...] = jnp.zeros_like(acc_sc)

    x = x_ref[...]                                   # (B, Tt, e)
    q = q_ref[...]                                   # (1, e)
    block_b, block_t = x.shape[0], x.shape[1]

    if mask_t:
        # Partial last t-block: zero the garbage time rows (so 0-weight times
        # garbage can never poison the accumulator) and mask their scores to
        # -inf so they get zero softmax weight.
        t_idx = j * block_t + jax.lax.broadcasted_iota(
            jnp.int32, (block_b, block_t), 1)
        valid = t_idx < t_total                      # (B, Tt)
        x = jnp.where(valid[..., None], x, jnp.zeros_like(x))

    # Attention scores: VPU multiply in the input dtype, f32-accumulated lane
    # reduce over e. No MXU (a (t, e) @ (e, 1) matmul would use 1/128th of it).
    scores = jnp.sum(x * q, axis=-1, dtype=jnp.float32)      # (B, Tt)
    if mask_t:
        scores = jnp.where(valid, scores, -jnp.inf)

    # Online (streaming) softmax over the t grid axis.
    m_prev = m_sc[...]                                        # (B, 1)
    m_new = jnp.maximum(m_prev, jnp.max(scores, axis=-1, keepdims=True))
    alpha = jnp.exp(m_prev - m_new)                           # (B, 1)
    w = jnp.exp(scores - m_new)                               # (B, Tt) f32

    l_sc[...] = alpha * l_sc[...] + jnp.sum(w, axis=-1, keepdims=True)
    # Weighted values: multiply in the input dtype, accumulate t-reduce in f32.
    wv = w.astype(x.dtype)[..., None]                         # (B, Tt, 1)
    acc_sc[...] = alpha * acc_sc[...] + jnp.sum(wv * x, axis=1,
                                                dtype=jnp.float32)
    m_sc[...] = m_new

    @pl.when(j == nt - 1)
    def _finalize():
        # Exact f32 divide (NOT approx reciprocal) for the final normalization.
        o_ref[...] = (acc_sc[...] / l_sc[...]).astype(o_ref.dtype)


def _pick_blocks(b, t, e, itemsize, block_b, block_t):
    """Choose (block_b, block_t) with VMEM lane padding + sublane packing."""
    e_lanes = ((e + 127) // 128) * 128            # 128-lane padded width
    b_align = 8 * max(1, 4 // itemsize)           # 8 (f32) / 16 (bf16) / 32 (i8)
    # Per-(batch, time) bytes live in VMEM: native-dtype tile + ~2 f32-sized
    # intermediates the compiler may materialize, all at lane-padded width.
    bytes_per_bt = e_lanes * (itemsize + 2 * 4)
    # ~6 MiB per grid step: with Pallas double-buffering + scratch this stays
    # well inside the scoped VMEM budget on v5e/v6e (128 MiB) and v7x (64 MiB).
    target = 6 * 1024 * 1024

    if block_t is None:
        if b_align * t * bytes_per_bt <= target:
            block_t = t                            # whole sequence resident
        else:
            block_t = max(8, (target // (b_align * bytes_per_bt)) // 8 * 8)
    block_t = min(block_t, t)

    if block_b is None:
        block_b = max(1, target // (block_t * bytes_per_bt))
        # Keep >= ~4 grid steps whenever the input is more than a couple MiB so
        # the automatic pipeline overlaps DMA with compute, and >= 2 batch
        # tiles so v7x can shard the "parallel" axis across its two TCs.
        if b * t * e_lanes * itemsize > 2 * 1024 * 1024:
            block_b = min(block_b, max(b_align, -(-b // 4)))
    if block_b < b:
        # dtype-aware sublane alignment keeps the (block_b, e) store dense
        block_b = max(b_align, (block_b // b_align) * b_align)
    block_b = min(block_b, b)
    return block_b, block_t


def attention_pooling(x, query, *, block_b=None, block_t=None,
                      vmem_limit_bytes=48 * 1024 * 1024):
    """x: (b, t, e), query: (e, 1) -> (b, e)."""
    b, t, e = x.shape
    assert query.shape == (e, 1)
    q_row = query.reshape(1, e).astype(x.dtype)    # lane-major query

    itemsize = jnp.dtype(x.dtype).itemsize
    block_b, block_t = _pick_blocks(b, t, e, itemsize, block_b, block_t)
    grid_b = pl.cdiv(b, block_b)
    grid_t = pl.cdiv(t, block_t)
    mask_t = (t % block_t) != 0

    kernel = functools.partial(_attn_pool_kernel, t_total=t, mask_t=mask_t)

    cost = pl.CostEstimate(
        flops=4 * b * t * e,                       # score + pooling mul/adds
        transcendentals=b * t,                     # exp per (batch, time)
        bytes_accessed=(b * t * e + b * e + e) * itemsize,
    )

    return pl.pallas_call(
        kernel,
        out_shape=jax.ShapeDtypeStruct((b, e), x.dtype),
        grid_spec=pltpu.PrefetchScalarGridSpec(
            num_scalar_prefetch=0,
            grid=(grid_b, grid_t),
            in_specs=[
                pl.BlockSpec((block_b, block_t, e), lambda i, j: (i, j, 0)),
                pl.BlockSpec((1, e), lambda i, j: (0, 0)),
            ],
            out_specs=pl.BlockSpec((block_b, e), lambda i, j: (i, 0)),
            scratch_shapes=[
                pltpu.VMEM((block_b, 1), jnp.float32),   # running max m
                pltpu.VMEM((block_b, 1), jnp.float32),   # running denom l
                pltpu.VMEM((block_b, e), jnp.float32),   # running weighted sum
            ],
        ),
        compiler_params=pltpu.CompilerParams(
            dimension_semantics=("parallel", "arbitrary"),
            vmem_limit_bytes=vmem_limit_bytes,
        ),
        cost_estimate=cost,
    )(x, q_row)


def attention_pooling_ref(x, query):
    scores = jnp.einsum("bte,eo->bt", x, query)
    w = jax.nn.softmax(scores, axis=1)
    return jnp.einsum("bt,bte->be", w, x)


def _check(out, ref, tag):
    assert out.shape == ref.shape, (tag, out.shape, ref.shape)
    err = float(jnp.max(jnp.abs(out - ref)))
    assert jnp.allclose(out, ref, atol=1e-3, rtol=1e-3), (tag, err)


if __name__ == "__main__":
    # 1) Small shapes consistent with the module (b=2, seq=8, emb=32).
    key = jax.random.PRNGKey(0)
    b, t, e = 2, 8, 32
    kx, kq = jax.random.split(key)
    x = jax.random.normal(kx, (b, t, e), dtype=jnp.float32)
    # Deterministic xavier_normal_-style init for query of shape (emb_in, 1).
    std = (2.0 / (e + 1)) ** 0.5
    query = std * jax.random.normal(kq, (e, 1), dtype=jnp.float32)

    out = jax.block_until_ready(attention_pooling(x, query))
    _check(out, attention_pooling_ref(x, query), "small")

    # 2) Batch-tiled path with a partial last batch block (no host-side pad).
    b2, t2, e2 = 20, 16, 128
    kx2, kq2 = jax.random.split(jax.random.PRNGKey(1))
    x2 = jax.random.normal(kx2, (b2, t2, e2), dtype=jnp.float32)
    q2 = ((2.0 / (e2 + 1)) ** 0.5) * jax.random.normal(
        kq2, (e2, 1), dtype=jnp.float32)
    out2 = jax.block_until_ready(attention_pooling(x2, q2, block_b=8))
    _check(out2, attention_pooling_ref(x2, q2), "batch_tiled")

    # 3) Online-softmax t-tiled path with a partial (masked) last t block.
    b3, t3, e3 = 4, 40, 128
    kx3, kq3 = jax.random.split(jax.random.PRNGKey(2))
    x3 = jax.random.normal(kx3, (b3, t3, e3), dtype=jnp.float32)
    q3 = ((2.0 / (e3 + 1)) ** 0.5) * jax.random.normal(
        kq3, (e3, 1), dtype=jnp.float32)
    out3 = jax.block_until_ready(attention_pooling(x3, q3, block_t=16))
    _check(out3, attention_pooling_ref(x3, q3), "t_tiled")

    print("KERNEL_OK")
</pallas_src>

<mosaic_0001>
module attributes {stable_mosaic.version = 11 : i64} {
  func.func @_attn_pool_kernel(%arg0: i32, %arg1: i32, %arg2: memref<2x8x32xf32, #tpu.memory_space<vmem>>, %arg3: memref<1x32xf32, #tpu.memory_space<vmem>>, %arg4: memref<2x32xf32, #tpu.memory_space<vmem>>, %arg5: memref<2x1xf32, #tpu.memory_space<vmem>>, %arg6: memref<2x1xf32, #tpu.memory_space<vmem>>, %arg7: memref<2x32xf32, #tpu.memory_space<vmem>>) attributes {dimension_semantics = [#tpu.dimension_semantics<parallel>, #tpu.dimension_semantics<arbitrary>], iteration_bounds = array<i64: 1, 1>, scalar_prefetch = 0 : i64, scratch_operands = 3 : i64, tpu.core_type = #tpu.core_type<tc>, window_params = [{transform_indices = @transform_0, window_bounds = array<i64: 2, 8, 32>}, {pipeline_mode = #tpu.pipeline_mode<synchronous>, transform_indices = @transform_1, window_bounds = array<i64: 1, 32>}, {transform_indices = @transform_2, window_bounds = array<i64: 2, 32>}]} {
    %c0_i32 = arith.constant 0 : i32
    %0 = arith.cmpi eq, %arg1, %c0_i32 : i32
    %1 = arith.extui %0 : i1 to i32
    %c0_i32_0 = arith.constant 0 : i32
    %2 = arith.cmpi ne, %1, %c0_i32_0 : i32
    scf.if %2 {
      %cst_22 = arith.constant 0xFF800000 : f32
      %37 = vector.broadcast %cst_22 : f32 to vector<2x1xf32>
      %c0_23 = arith.constant 0 : index
      %c0_24 = arith.constant 0 : index
      %38 = vector.load %arg5[%c0_23, %c0_24] : memref<2x1xf32, #tpu.memory_space<vmem>>, vector<2x1xf32>
      tpu.vector_store %arg5[%c0_23, %c0_24], %37 {strides = array<i32>} : memref<2x1xf32, #tpu.memory_space<vmem>>, vector<2x1xf32>,
      %cst_25 = arith.constant 0.000000e+00 : f32
      %39 = vector.broadcast %cst_25 : f32 to vector<2x1xf32>
      %c0_26 = arith.constant 0 : index
      %c0_27 = arith.constant 0 : index
      %40 = vector.load %arg6[%c0_26, %c0_27] : memref<2x1xf32, #tpu.memory_space<vmem>>, vector<2x1xf32>
      tpu.vector_store %arg6[%c0_26, %c0_27], %39 {strides = array<i32>} : memref<2x1xf32, #tpu.memory_space<vmem>>, vector<2x1xf32>,
      %cst_28 = arith.constant 0.000000e+00 : f32
      %41 = vector.broadcast %cst_28 : f32 to vector<2x32xf32>
      %c0_29 = arith.constant 0 : index
      %c0_30 = arith.constant 0 : index
      %42 = vector.load %arg7[%c0_29, %c0_30] : memref<2x32xf32, #tpu.memory_space<vmem>>, vector<2x32xf32>
      tpu.vector_store %arg7[%c0_29, %c0_30], %41 {strides = array<i32>} : memref<2x32xf32, #tpu.memory_space<vmem>>, vector<2x32xf32>,
    } else {
    }
    %c0 = arith.constant 0 : index
    %c0_1 = arith.constant 0 : index
    %c0_2 = arith.constant 0 : index
    %3 = vector.load %arg2[%c0, %c0_1, %c0_2] : memref<2x8x32xf32, #tpu.memory_space<vmem>>, vector<2x8x32xf32>
    %c0_3 = arith.constant 0 : index
    %c0_4 = arith.constant 0 : index
    %4 = vector.load %arg3[%c0_3, %c0_4] : memref<1x32xf32, #tpu.memory_space<vmem>>, vector<1x32xf32>
    %5 = vector.shape_cast %4 : vector<1x32xf32> to vector<1x1x32xf32>
    %6 = vector.broadcast %5 : vector<1x1x32xf32> to vector<2x8x32xf32>
    %7 = arith.mulf %3, %6 : vector<2x8x32xf32>
    %cst = arith.constant dense<0.000000e+00> : vector<2x8xf32>
    %8 = vector.multi_reduction <add>, %7, %cst [2] : vector<2x8x32xf32> to vector<2x8xf32>
    %c0_5 = arith.constant 0 : index
    %c0_6 = arith.constant 0 : index
    %9 = vector.load %arg5[%c0_5, %c0_6] : memref<2x1xf32, #tpu.memory_space<vmem>>, vector<2x1xf32>
    %cst_7 = arith.constant dense<0xFF800000> : vector<2xf32>
    %10 = vector.multi_reduction <maximumf>, %8, %cst_7 [1] : vector<2x8xf32> to vector<2xf32>
    %11 = vector.shape_cast %10 : vector<2xf32> to vector<2x1xf32>
    %12 = arith.maximumf %9, %11 : vector<2x1xf32>
    %13 = arith.subf %9, %12 : vector<2x1xf32>
    %14 = math.exp %13 : vector<2x1xf32>
    %15 = vector.broadcast %12 : vector<2x1xf32> to vector<2x8xf32>
    %16 = arith.subf %8, %15 : vector<2x8xf32>
    %17 = math.exp %16 : vector<2x8xf32>
    %c0_8 = arith.constant 0 : index
    %c0_9 = arith.constant 0 : index
    %18 = vector.load %arg6[%c0_8, %c0_9] : memref<2x1xf32, #tpu.memory_space<vmem>>, vector<2x1xf32>
    %19 = arith.mulf %14, %18 : vector<2x1xf32>
    %cst_10 = arith.constant dense<0.000000e+00> : vector<2xf32>
    %20 = vector.multi_reduction <add>, %17, %cst_10 [1] : vector<2x8xf32> to vector<2xf32>
    %21 = vector.shape_cast %20 : vector<2xf32> to vector<2x1xf32>
    %22 = arith.addf %19, %21 : vector<2x1xf32>
    %c0_11 = arith.constant 0 : index
    %c0_12 = arith.constant 0 : index
    %23 = vector.load %arg6[%c0_11, %c0_12] : memref<2x1xf32, #tpu.memory_space<vmem>>, vector<2x1xf32>
    tpu.vector_store %arg6[%c0_11, %c0_12], %22 {strides = array<i32>} : memref<2x1xf32, #tpu.memory_space<vmem>>, vector<2x1xf32>,
    %24 = vector.shape_cast %17 : vector<2x8xf32> to vector<2x8x1xf32>
    %c0_13 = arith.constant 0 : index
    %c0_14 = arith.constant 0 : index
    %25 = vector.load %arg7[%c0_13, %c0_14] : memref<2x32xf32, #tpu.memory_space<vmem>>, vector<2x32xf32>
    %26 = vector.broadcast %14 : vector<2x1xf32> to vector<2x32xf32>
    %27 = arith.mulf %26, %25 : vector<2x32xf32>
    %28 = vector.broadcast %24 : vector<2x8x1xf32> to vector<2x8x32xf32>
    %29 = arith.mulf %28, %3 : vector<2x8x32xf32>
    %cst_15 = arith.constant dense<0.000000e+00> : vector<2x32xf32>
    %30 = vector.multi_reduction <add>, %29, %cst_15 [1] : vector<2x8x32xf32> to vector<2x32xf32>
    %31 = arith.addf %27, %30 : vector<2x32xf32>
    %c0_16 = arith.constant 0 : index
    %c0_17 = arith.constant 0 : index
    %32 = vector.load %arg7[%c0_16, %c0_17] : memref<2x32xf32, #tpu.memory_space<vmem>>, vector<2x32xf32>
    tpu.vector_store %arg7[%c0_16, %c0_17], %31 {strides = array<i32>} : memref<2x32xf32, #tpu.memory_space<vmem>>, vector<2x32xf32>,
    %c0_18 = arith.constant 0 : index
    %c0_19 = arith.constant 0 : index
    %33 = vector.load %arg5[%c0_18, %c0_19] : memref<2x1xf32, #tpu.memory_space<vmem>>, vector<2x1xf32>
    tpu.vector_store %arg5[%c0_18, %c0_19], %12 {strides = array<i32>} : memref<2x1xf32, #tpu.memory_space<vmem>>, vector<2x1xf32>,
    %c0_i32_20 = arith.constant 0 : i32
    %34 = arith.cmpi eq, %arg1, %c0_i32_20 : i32
    %35 = arith.extui %34 : i1 to i32
    %c0_i32_21 = arith.constant 0 : i32
    %36 = arith.cmpi ne, %35, %c0_i32_21 : i32
    scf.if %36 {
      %c0_22 = arith.constant 0 : index
      %c0_23 = arith.constant 0 : index
      %37 = vector.load %arg7[%c0_22, %c0_23] : memref<2x32xf32, #tpu.memory_space<vmem>>, vector<2x32xf32>
      %c0_24 = arith.constant 0 : index
      %c0_25 = arith.constant 0 : index
      %38 = vector.load %arg6[%c0_24, %c0_25] : memref<2x1xf32, #tpu.memory_space<vmem>>, vector<2x1xf32>
      %39 = vector.broadcast %38 : vector<2x1xf32> to vector<2x32xf32>
      %40 = arith.divf %37, %39 : vector<2x32xf32>
      %c0_26 = arith.constant 0 : index
      %c0_27 = arith.constant 0 : index
      %41 = vector.load %arg4[%c0_26, %c0_27] : memref<2x32xf32, #tpu.memory_space<vmem>>, vector<2x32xf32>
      tpu.vector_store %arg4[%c0_26, %c0_27], %40 {strides = array<i32>} : memref<2x32xf32, #tpu.memory_space<vmem>>, vector<2x32xf32>,
    } else {
    }
    return
  }
  func.func @transform_0(%arg0: i32, %arg1: i32) -> (i32, i32, i32) {
    %c0_i32 = arith.constant 0 : i32
    %c0_i32_0 = arith.constant 0 : i32
    return %arg0, %arg1, %c0_i32 : i32, i32, i32
  }
  func.func @transform_1(%arg0: i32, %arg1: i32) -> (i32, i32) {
    %c0_i32 = arith.constant 0 : i32
    %c0_i32_0 = arith.constant 0 : i32
    %c0_i32_1 = arith.constant 0 : i32
    return %c0_i32, %c0_i32_0 : i32, i32
  }
  func.func @transform_2(%arg0: i32, %arg1: i32) -> (i32, i32) {
    %c0_i32 = arith.constant 0 : i32
    %c0_i32_0 = arith.constant 0 : i32
    return %arg0, %c0_i32 : i32, i32
  }
}

</mosaic_0001>

<bundles_post_ra>
// kernel: tpu_custom_call.1
= control target key start
LH: loop header
LB: loop body
LE: loop exit
PB: predicated region body
PF: predicated region fallthrough
CT: control target
= control target key end

     0   :  { %7 = vsyncpa [#allocation6], 0  ;;  %s301_s0 = inlined_call_operand.hbm [shape: f32[2,8,32], index: 0, kind: input, shape index: {}]   ;;  %s302_s1 = inlined_call_operand.vmem [shape: f32[1,32], index: 1, kind: input, shape index: {}]   ;;  %s303_s2 = inlined_call_operand.hbm [shape: f32[2,32], index: 2, kind: output, shape index: {}]  }
   0x1   :  { %8 = vsyncpa [#allocation7], 0  ;;  %s246_s9 = smov [#allocation5]  }
   0x2   :  { %s14_s10 = sshll.u32 %s246_s9, 4  ;;  %s15_s10 = int_to_ptr.vmem [resolvable:$true] %s14_s10 }
   0x3   :  { %s210_s11 = scalar_lea.vmem %s15_s10, 256  ;;  %p215_p1 = scmp.lt.s32.totalorder %s15_s10, %s15_s10 }
   0x4   :  { %p211_p0 = scmp.ne.s32.totalorder %s15_s10, %s210_s11  ;;  %p216_p2 = scmp.lt.s32.totalorder %s210_s11, %s210_s11 }
   0x6   :  { %p217_p3 = por %p216_p2, %p215_p1 }
   0x8   :  { %p218_p4 = pnand %p217_p3, %p211_p0 }
   0xa   :  { %221 = shalt.err (!%p218_p4)
}
   0xb   :  { %s247_s12 = smov 128   ;;  %s248_s13 = smov 8  }
   0xc   :  { %20 = dma.hbm_to_vmem [thread:$0]  %s301_s0, 256, %s15_s10, [#allocation6], %s247_s12, %s247_s12, %s248_s13  }
   0xd   :  { %242 = dma.done.wait [#allocation6], 256  }
   0xe   :  { %243 = vsyncadd [#allocation6], 4294967040  ;;  %v271_v0 = vld [vmem:[#allocation5] sm:$0xff]  ;;  %v184_v1 = vld [vmem:[%s302_s1] ss:$0 sm:$0xff]  ;;  %vm46_vm0 = vcmask 261120   ;;  %v56_v8 = vlaneseq }
   0xf   :  { %v276_v2 = vld [vmem:[#allocation5 + $0x8] sm:$0xff]  ;;  %v44_v3 = vmul.f32 %v184_v1, %v271_v0  ;;  %vm30_vm1 = vcmask 1024   ;;  %v249_v7 = vmov -inf   ;;  %vm66_vm2 = vcmask 1041409   ;;  %s252_s0 = smov [#allocation8]  }
  0x10   :  { %v45_v4 = vmul.f32 %v184_v1, %v276_v2  ;;  %31 = vst.msk [vmem:[#allocation2] sm:$0x3] %vm30_vm1, %v249_v7  ;;  %v57_v9 = vand.u32 127, %v56_v8  ;;  %v59_v10 = vshrl.u32 %v56_v8, 7  ;;  %vm69_vm3 = vcmask 58368   ;;  %s175_s1 = sshll.u32 %s252_s0, 4  ;;  %s176_s1 = int_to_ptr.vmem [resolvable:$true] %s175_s1 }
  0x11   :  { %v47_v5 = vsel %vm46_vm0, %v44_v3, 0.0  ;;  %v250_v18 = vmov 0   ;;  %v251_v19 = vmov 0.0   ;;  %vm33_vm4 = vcmask 254976   ;;  %s222_s18 = scalar_lea.vmem %s176_s1, 32  ;;  %p227_p6 = scmp.lt.s32.totalorder %s176_s1, %s176_s1 }
  0x12   :  { %48 = vadd.xlane.f32.xlu0 %v47_v5  ;;  %v50_v6 = vsel %vm46_vm0, %v45_v4, 0.0  ;;  %v60_v12 = vsub.s32 %v57_v9, %v59_v10  ;;  %192 = vset.pattern.permute.xlu1 %v250_v18  ;;  %32 = vst.msk [vmem:[#allocation3] sm:$0x3] %vm30_vm1, %v251_v19  ;;  %v83_v24 = vsub.s32 0, %v59_v10  ;;  %v87_v25 = vsub.s32 1, %v59_v10  ;;  %p223_p5 = scmp.ne.s32.totalorder %s176_s1, %s222_s18  ;;  %p228_p7 = scmp.lt.s32.totalorder %s222_s18, %s222_s18 }
  0x13   :  { %193 = vset.pattern.permute.xlu0 %v250_v18  ;;  %34 = vst.msk [vmem:[#allocation4] sm:$0x3] %vm33_vm4, %v251_v19 }
  0x14   :  { %p229_p8 = por %p228_p7, %p227_p6 }
  0x16   :  { %51 = vadd.xlane.f32.xlu0 %v50_v6  ;;  %p230_p9 = pnand %p229_p8, %p223_p5 }
  0x17   :  { %v53_v20 = vld [vmem:[#allocation2] sm:$0x3] }
  0x19   :  { %v97_v43 = vld [vmem:[#allocation3] sm:$0x3] }
  0x1a   :  { %v123_v63 = vld [vmem:[#allocation4] sm:$0x3] }
  0x9b   :  { %v49_v11 = vpop.xlane.xlu0 %48 }
  0x9c   :  { %v61_v14 = vrot.slane %v49_v11, %v60_v12 }
  0x9f   :  { %v52_v13 = vpop.xlane.xlu0 %51 }
  0xa0   :  { %v65_v15 = vrot.slane %v52_v13, %v60_v12 }
  0xa2   :  { %v67_v16 = vsel %vm66_vm2, %v65_v15, %v61_v14 }
  0xa3   :  { %v70_v17 = vsel %vm69_vm3, %v67_v16, -inf }
  0xa4   :  { %71 = vmax.xlane.f32.xlu1 %v70_v17 }
 0x12d   :  { %v72_v21 = vpop.xlane.xlu1 %71 }
 0x12e   :  { %v73_v22 = vmax.f32 %v53_v20, %v72_v21 }
 0x130   :  { %v74_v23 = vsub.f32 %v53_v20, %v73_v22  ;;  %155 = vst.msk [vmem:[#allocation2] sm:$0x3] %vm30_vm1, %v73_v22  ;;  %79 = vperm.xlu1 %192, %v73_v22  }
 0x132   :  { %v75_v41 = vmul.f32 1.442695, %v74_v23 }
 0x1ab   :  { %v80_v26 = vpop.permute.xlu1 %79 }
 0x1ac   :  { %v84_v27 = vrot.slane %v80_v26, %v83_v24  ;;  %v88_v28 = vrot.slane %v80_v26, %v87_v25 }
 0x1ae   :  { %v91_v29 = vsub.f32 %v49_v11, %v84_v27  ;;  %v92_v30 = vsub.f32 %v52_v13, %v88_v28 }
 0x1b0   :  { %v93_v31 = vmul.f32 1.442695, %v91_v29  ;;  %v95_v32 = vmul.f32 1.442695, %v92_v30 }
 0x1b2   :  { %194 = vpow2.f32 %v93_v31 }
 0x1b3   :  { %196 = vpow2.f32 %v95_v32 }
 0x1b4   :  { %198 = vpow2.f32 %v75_v41 }
 0x1bf   :  { %v195_v33 = vpop.eup %194 }
 0x1c0   :  { %v197_v34 = vpop.eup %196  ;;  %102 = vperm.xlu0 %193, %v195_v33  }
 0x1c1   :  { %105 = vperm.xlu1 %192, %v197_v34   ;;  %v199_v42 = vpop.eup %198 }
 0x1c2   :  { %v98_v44 = vmul.f32 %v199_v42, %v97_v43 }
 0x23b   :  { %v103_v35 = vpop.permute.xlu0 %102 }
 0x23c   :  { %v106_v36 = vpop.permute.xlu1 %105  ;;  %v110_v37 = vrot.slane %v103_v35, %v60_v12  ;;  %v132_v49 = vmul.f32 %v103_v35, %v271_v0 }
 0x23d   :  { %v114_v38 = vrot.slane %v106_v36, %v60_v12  ;;  %v133_v48 = vmul.f32 %v106_v36, %v276_v2 }
 0x23e   :  { %v134_v51 = vsel %vm46_vm0, %v132_v49, 0.0 }
 0x23f   :  { %v115_v39 = vsel %vm66_vm2, %v114_v38, %v110_v37  ;;  %v141_v50 = vsel %vm46_vm0, %v133_v48, 0.0  ;;  %v135_v53 = vrot.slane %v134_v51, 4 }
 0x240   :  { %v117_v40 = vsel %vm69_vm3, %v115_v39, 0.0  ;;  %v142_v52 = vrot.slane %v141_v50, 4 }
 0x241   :  { %118 = vadd.xlane.f32.xlu1 %v117_v40  ;;  %v136_v55 = vadd.f32 %v135_v53, %v134_v51 }
 0x242   :  { %v143_v54 = vadd.f32 %v142_v52, %v141_v50 }
 0x243   :  { %v137_v57 = vrot.slane %v136_v55, 2 }
 0x244   :  { %v144_v56 = vrot.slane %v143_v54, 2 }
 0x245   :  { %v138_v59 = vadd.f32 %v137_v57, %v136_v55 }
 0x246   :  { %v145_v58 = vadd.f32 %v144_v56, %v143_v54 }
 0x247   :  { %v139_v61 = vrot.slane %v138_v59, 1 }
 0x248   :  { %v146_v60 = vrot.slane %v145_v58, 1 }
 0x249   :  { %v140_v1 = vadd.f32 %v139_v61, %v138_v59 }
 0x24a   :  { %v147_v2 = vadd.f32 %v146_v60, %v145_v58 }
 0x24c   :  { %v150_v4 = vsel %vm66_vm2, %v147_v2, %v140_v1 }
 0x2ca   :  { %v119_v45 = vpop.xlane.xlu1 %118 }
 0x2cb   :  { %v120_v46 = vadd.f32 %v119_v45, %v98_v44 }
 0x2cd   :  { %122 = vst.msk [vmem:[#allocation3] sm:$0x3] %vm30_vm1, %v120_v46 }
 0x2d4   :  { %v160_v47 = vld [vmem:[#allocation3] sm:$0x3] }
 0x2d5   :  { %163 = vperm.xlu0 %193, %v160_v47  }
 0x2d9   :  { %126 = vperm.xlu0 %193, %v199_v42  }
 0x350   :  { %v164_v62 = vpop.permute.xlu0 %163 }
 0x351   :  { %200 = vrcp.f32 %v164_v62 }
 0x354   :  { %v127_v0 = vpop.permute.xlu0 %126 }
 0x355   :  { %v129_v3 = vmul.f32 %v127_v0, %v123_v63 }
 0x357   :  { %v152_v5 = vadd.f32 %v150_v4, %v129_v3 }
 0x359   :  { %154 = vst.msk [vmem:[#allocation4] sm:$0x3] %vm33_vm4, %v152_v5 }
 0x35e   :  { %v201_v6 = vpop.eup %200 }
 0x360   :  { %v159_v7 = vld [vmem:[#allocation4] sm:$0x3] }
 0x361   :  { %v167_v8 = vmul.f32 %v201_v6, %v159_v7 }
 0x363   :  { %168 = vst.msk [vmem:[#allocation8] sm:$0x3] %vm33_vm4, %v167_v8 }
 0x364   :  { %233 = shalt.err (!%p230_p9)
}
 0x365   :  { %178 = dma.vmem_to_hbm [thread:$0]  %s176_s1, 32, %s303_s2, [#allocation7]  }
 0x366   :  { %244 = dma.done.wait [#allocation7], 32  }
 0x367   :  { %245 = vsyncadd [#allocation7], 4294967264 }
 0x368   :  { %182 = vsyncpa [#allocation6], 1 }
 0x369   :  { %183 = vsyncpa [#allocation7], 1 }

</bundles_post_ra>
